<compile_context>
chip_gen: v7x
topology: tpu7x:2x2x1
jax: 0.10.0
libtpu: 0.0.40
codegen_flags: <defaults>
</compile_context>

<pallas_src>
import numpy as np
import jax
import jax.numpy as jnp
from jax import lax
from jax.experimental import pallas as pl
from jax.experimental.pallas import tpu as pltpu


def _cwt_kernel(s_ref, out_ref):
    # s_ref (SMEM, f32[8]): [t, cos(phi), sin(phi), cos(th), sin(th), 0, 0, 0]
    t = s_ref[0]
    cp = s_ref[1]
    sp = s_ref[2]
    ct = s_ref[3]
    st = s_ref[4]

    st_cp = st * cp
    ct_cp = ct * cp
    zero = jnp.float32(0.0)
    one = jnp.float32(1.0)

    # Closed form of  flip @ rot_theta @ rot_phi @ trans :
    #   [[-ct, st*sp, st*cp, st*cp*t],
    #    [ st, ct*sp, ct*cp, ct*cp*t],
    #    [  0,    cp,   -sp,   -sp*t],
    #    [  0,     0,     0,       1]]
    vals = (
        -ct,  st * sp, st_cp, st_cp * t,
        st,   ct * sp, ct_cp, ct_cp * t,
        zero, cp,      -sp,   -sp * t,
        zero, zero,    zero,  one,
    )

    row = lax.broadcasted_iota(jnp.int32, (4, 4), 0)
    col = lax.broadcasted_iota(jnp.int32, (4, 4), 1)
    flat = row * 4 + col

    out = jnp.zeros((4, 4), jnp.float32)
    for k, v in enumerate(vals):
        if k in (8, 12, 13, 14):  # entries that stay exactly zero
            continue
        out = jnp.where(flat == k, v, out)
    out_ref[...] = out


@jax.jit
def cwt(t, phi_deg, th_deg):
    # Cheap scalar glue: degrees->radians + trig, packed into one SMEM vector.
    phi = jnp.asarray(phi_deg, jnp.float32) / 180.0 * jnp.pi
    th = jnp.asarray(th_deg, jnp.float32) / 180.0 * jnp.pi
    zero = jnp.float32(0.0)
    scalars = jnp.stack([
        jnp.asarray(t, jnp.float32),
        jnp.cos(phi), jnp.sin(phi),
        jnp.cos(th), jnp.sin(th),
        zero, zero, zero,
    ]).astype(jnp.float32)

    return pl.pallas_call(
        _cwt_kernel,
        out_shape=jax.ShapeDtypeStruct((4, 4), jnp.float32),
        in_specs=[pl.BlockSpec(memory_space=pltpu.MemorySpace.SMEM)],
        out_specs=pl.BlockSpec(memory_space=pltpu.MemorySpace.VMEM),
    )(scalars)


def _reference(t, phi_deg, th_deg):
    """Numpy (float64) replica of the PyTorch forward."""
    t = float(t)
    phi = float(phi_deg) / 180.0 * np.pi
    th = float(th_deg) / 180.0 * np.pi
    trans = np.array([[1, 0, 0, 0],
                      [0, 1, 0, 0],
                      [0, 0, 1, t],
                      [0, 0, 0, 1]], dtype=np.float64)
    rot_phi = np.array([[1, 0, 0, 0],
                        [0, np.cos(phi), -np.sin(phi), 0],
                        [0, np.sin(phi), np.cos(phi), 0],
                        [0, 0, 0, 1]], dtype=np.float64)
    rot_theta = np.array([[np.cos(th), 0, -np.sin(th), 0],
                          [0, 1, 0, 0],
                          [np.sin(th), 0, np.cos(th), 0],
                          [0, 0, 0, 1]], dtype=np.float64)
    flip = np.array([[-1, 0, 0, 0],
                     [0, 0, 1, 0],
                     [0, 1, 0, 0],
                     [0, 0, 0, 1]], dtype=np.float64)
    return (flip @ rot_theta @ rot_phi @ trans).astype(np.float32)


if __name__ == "__main__":
    key = jax.random.PRNGKey(0)
    k_t, k_phi, k_th = jax.random.split(key, 3)
    # Scalar inputs consistent with the module's forward signature (t, phi, th).
    t = jax.random.uniform(k_t, (), jnp.float32, minval=2.0, maxval=6.0)
    phi = jax.random.uniform(k_phi, (), jnp.float32, minval=-90.0, maxval=90.0)
    th = jax.random.uniform(k_th, (), jnp.float32, minval=-180.0, maxval=180.0)

    c2w = cwt(t, phi, th)
    jax.block_until_ready(c2w)

    ref = _reference(t, phi, th)
    assert c2w.shape == (4, 4) and c2w.dtype == jnp.float32
    assert np.allclose(np.asarray(c2w), ref, atol=1e-5, rtol=1e-5)
    print("KERNEL_OK")
</pallas_src>

<mosaic_0001>
module attributes {stable_mosaic.version = 11 : i64} {
  func.func @_cwt_kernel(%arg0: memref<8xf32, #tpu.memory_space<smem>>, %arg1: memref<4x4xf32, #tpu.memory_space<vmem>>) attributes {dimension_semantics = [], scalar_prefetch = 0 : i64, scratch_operands = 0 : i64, tpu.core_type = #tpu.core_type<tc>} {
    %c0 = arith.constant 0 : index
    %0 = memref.load %arg0[%c0] : memref<8xf32, #tpu.memory_space<smem>>
    %c1 = arith.constant 1 : index
    %1 = memref.load %arg0[%c1] : memref<8xf32, #tpu.memory_space<smem>>
    %c2 = arith.constant 2 : index
    %2 = memref.load %arg0[%c2] : memref<8xf32, #tpu.memory_space<smem>>
    %c3 = arith.constant 3 : index
    %3 = memref.load %arg0[%c3] : memref<8xf32, #tpu.memory_space<smem>>
    %c4 = arith.constant 4 : index
    %4 = memref.load %arg0[%c4] : memref<8xf32, #tpu.memory_space<smem>>
    %5 = arith.mulf %4, %1 : f32
    %6 = arith.mulf %3, %1 : f32
    %cst = arith.constant 0.000000e+00 : f32
    %7 = arith.subf %cst, %3 : f32
    %8 = arith.mulf %4, %2 : f32
    %9 = arith.mulf %5, %0 : f32
    %10 = arith.mulf %3, %2 : f32
    %11 = arith.mulf %6, %0 : f32
    %cst_0 = arith.constant 0.000000e+00 : f32
    %12 = arith.subf %cst_0, %2 : f32
    %cst_1 = arith.constant 0.000000e+00 : f32
    %13 = arith.subf %cst_1, %2 : f32
    %14 = arith.mulf %13, %0 : f32
    %15 = tpu.iota {dimensions = array<i32: 0>} : vector<4x4xi32>
    %16 = tpu.iota {dimensions = array<i32: 1>} : vector<4x4xi32>
    %c4_i32 = arith.constant 4 : i32
    %17 = vector.broadcast %c4_i32 : i32 to vector<4x4xi32>
    %18 = arith.muli %15, %17 : vector<4x4xi32>
    %19 = arith.addi %18, %16 : vector<4x4xi32>
    %cst_2 = arith.constant 0.000000e+00 : f32
    %20 = vector.broadcast %cst_2 : f32 to vector<4x4xf32>
    %c0_i32 = arith.constant 0 : i32
    %21 = vector.broadcast %c0_i32 : i32 to vector<4x4xi32>
    %22 = arith.cmpi eq, %19, %21 : vector<4x4xi32>
    %23 = vector.broadcast %7 : f32 to vector<4x4xf32>
    %24 = arith.select %22, %23, %20 : vector<4x4xi1>, vector<4x4xf32>
    %c1_i32 = arith.constant 1 : i32
    %25 = vector.broadcast %c1_i32 : i32 to vector<4x4xi32>
    %26 = arith.cmpi eq, %19, %25 : vector<4x4xi32>
    %27 = vector.broadcast %8 : f32 to vector<4x4xf32>
    %28 = arith.select %26, %27, %24 : vector<4x4xi1>, vector<4x4xf32>
    %c2_i32 = arith.constant 2 : i32
    %29 = vector.broadcast %c2_i32 : i32 to vector<4x4xi32>
    %30 = arith.cmpi eq, %19, %29 : vector<4x4xi32>
    %31 = vector.broadcast %5 : f32 to vector<4x4xf32>
    %32 = arith.select %30, %31, %28 : vector<4x4xi1>, vector<4x4xf32>
    %c3_i32 = arith.constant 3 : i32
    %33 = vector.broadcast %c3_i32 : i32 to vector<4x4xi32>
    %34 = arith.cmpi eq, %19, %33 : vector<4x4xi32>
    %35 = vector.broadcast %9 : f32 to vector<4x4xf32>
    %36 = arith.select %34, %35, %32 : vector<4x4xi1>, vector<4x4xf32>
    %c4_i32_3 = arith.constant 4 : i32
    %37 = vector.broadcast %c4_i32_3 : i32 to vector<4x4xi32>
    %38 = arith.cmpi eq, %19, %37 : vector<4x4xi32>
    %39 = vector.broadcast %4 : f32 to vector<4x4xf32>
    %40 = arith.select %38, %39, %36 : vector<4x4xi1>, vector<4x4xf32>
    %c5_i32 = arith.constant 5 : i32
    %41 = vector.broadcast %c5_i32 : i32 to vector<4x4xi32>
    %42 = arith.cmpi eq, %19, %41 : vector<4x4xi32>
    %43 = vector.broadcast %10 : f32 to vector<4x4xf32>
    %44 = arith.select %42, %43, %40 : vector<4x4xi1>, vector<4x4xf32>
    %c6_i32 = arith.constant 6 : i32
    %45 = vector.broadcast %c6_i32 : i32 to vector<4x4xi32>
    %46 = arith.cmpi eq, %19, %45 : vector<4x4xi32>
    %47 = vector.broadcast %6 : f32 to vector<4x4xf32>
    %48 = arith.select %46, %47, %44 : vector<4x4xi1>, vector<4x4xf32>
    %c7_i32 = arith.constant 7 : i32
    %49 = vector.broadcast %c7_i32 : i32 to vector<4x4xi32>
    %50 = arith.cmpi eq, %19, %49 : vector<4x4xi32>
    %51 = vector.broadcast %11 : f32 to vector<4x4xf32>
    %52 = arith.select %50, %51, %48 : vector<4x4xi1>, vector<4x4xf32>
    %c9_i32 = arith.constant 9 : i32
    %53 = vector.broadcast %c9_i32 : i32 to vector<4x4xi32>
    %54 = arith.cmpi eq, %19, %53 : vector<4x4xi32>
    %55 = vector.broadcast %1 : f32 to vector<4x4xf32>
    %56 = arith.select %54, %55, %52 : vector<4x4xi1>, vector<4x4xf32>
    %c10_i32 = arith.constant 10 : i32
    %57 = vector.broadcast %c10_i32 : i32 to vector<4x4xi32>
    %58 = arith.cmpi eq, %19, %57 : vector<4x4xi32>
    %59 = vector.broadcast %12 : f32 to vector<4x4xf32>
    %60 = arith.select %58, %59, %56 : vector<4x4xi1>, vector<4x4xf32>
    %c11_i32 = arith.constant 11 : i32
    %61 = vector.broadcast %c11_i32 : i32 to vector<4x4xi32>
    %62 = arith.cmpi eq, %19, %61 : vector<4x4xi32>
    %63 = vector.broadcast %14 : f32 to vector<4x4xf32>
    %64 = arith.select %62, %63, %60 : vector<4x4xi1>, vector<4x4xf32>
    %c15_i32 = arith.constant 15 : i32
    %65 = vector.broadcast %c15_i32 : i32 to vector<4x4xi32>
    %66 = arith.cmpi eq, %19, %65 : vector<4x4xi32>
    %cst_4 = arith.constant 1.000000e+00 : f32
    %67 = vector.broadcast %cst_4 : f32 to vector<4x4xf32>
    %68 = arith.select %66, %67, %64 : vector<4x4xi1>, vector<4x4xf32>
    %c0_5 = arith.constant 0 : index
    %c0_6 = arith.constant 0 : index
    %69 = vector.load %arg1[%c0_5, %c0_6] : memref<4x4xf32, #tpu.memory_space<vmem>>, vector<4x4xf32>
    tpu.vector_store %arg1[%c0_5, %c0_6], %68 {strides = array<i32>} : memref<4x4xf32, #tpu.memory_space<vmem>>, vector<4x4xf32>,
    return
  }
}

</mosaic_0001>

<bundles_post_ra>
// kernel: cwt.1
= control target key start
LH: loop header
LB: loop body
LE: loop exit
PB: predicated region body
PF: predicated region fallthrough
CT: control target
= control target key end

     0   :  { %6 = vsyncpa [#allocation4], 0  ;;  %s194_s0 = inlined_call_operand.vmem [shape: f32[8], index: 0, kind: input, shape index: {}]   ;;  %s195_s1 = inlined_call_operand.hbm [shape: f32[4,4], index: 1, kind: output, shape index: {}]  }
   0x1   :  { %7 = vsyncpa [#allocation3], 0  ;;  %s14_s8 = sshll.u32 %s194_s0, 4  ;;  %s15_s8 = int_to_ptr.vmem [resolvable:$true] %s14_s8 }
   0x2   :  { %s100_s9 = scalar_lea.vmem %s15_s8, 16  ;;  %p105_p1 = scmp.lt.s32.totalorder %s15_s8, %s15_s8 }
   0x3   :  { %p101_p0 = scmp.ne.s32.totalorder %s15_s8, %s100_s9  ;;  %p106_p2 = scmp.lt.s32.totalorder %s100_s9, %s100_s9 }
   0x5   :  { %p107_p3 = por %p106_p2, %p105_p1 }
   0x7   :  { %p108_p4 = pnand %p107_p3, %p101_p0 }
   0x9   :  { %111 = shalt.err (!%p108_p4)
}
   0xa   :  { %s138_s10 = smov [#allocation2]  }
   0xb   :  { %17 = dma.vmem_to_smem %s15_s8, 16, %s138_s10, [#allocation4]  }
   0xc   :  { %134 = dma.done.wait [#allocation4], 16  }
   0xd   :  { %135 = vsyncadd [#allocation4], 4294967280 }
   0xe   :  { %21 = sfence }
   0xf   :  { %s153_s11 = sld [smem:[#allocation2 + $0x1]]  ;;  %v36_v0 = vlaneseq  ;;  %s155_s12 = sld [smem:[#allocation2 + $0x2]]  ;;  %vm77_vm12 = vcmask 27648  }
  0x10   :  { %s157_s0 = sld [smem:[#allocation2 + $0x3]]  ;;  %s159_s13 = sld [smem:[#allocation2]] }
  0x11   :  { %s161_s14 = sld [smem:[#allocation2 + $0x4]]  ;;  %v37_v1 = vshrl.u32 %v36_v0, 7  ;;  %v39_v2 = vand.u32 127, %v36_v0  ;;  %s139_s24 = smov [#allocation5]  }
  0x12   :  { %s85_s25 = sshll.u32 %s139_s24, 4  ;;  %s86_s25 = int_to_ptr.vmem [resolvable:$true] %s85_s25 }
  0x13   :  { %v40_v3 = vmul.u32 4, %v37_v1  ;;  %s112_s26 = scalar_lea.vmem %s86_s25, 64  ;;  %p117_p6 = scmp.lt.s32.totalorder %s86_s25, %s86_s25 }
  0x14   :  { %p113_p5 = scmp.ne.s32.totalorder %s86_s25, %s112_s26  ;;  %p118_p7 = scmp.lt.s32.totalorder %s112_s26, %s112_s26 }
  0x15   :  { %v41_v4 = vadd.s32 %v40_v3, %v39_v2  ;;  %s34_s20 = ssub.f32 0.0, %s155_s12  ;;  %v67_v19 = vstv %s153_s11 }
  0x16   :  { %s165_s15 = smul.f32 %s157_s0, %s153_s11  ;;  %s29_s16 = ssub.f32 0.0, %s157_s0 }
  0x17   :  { %s27_s17 = smul.f32 %s161_s14, %s153_s11  ;;  %vm42_vm0 = vcmp.eq.s32.totalorder %v41_v4, 0  ;;  %vm45_vm1 = vcmp.eq.s32.totalorder %v41_v4, 1  ;;  %vm48_vm2 = vcmp.eq.s32.totalorder %v41_v4, 2  ;;  %vm51_vm3 = vcmp.eq.s32.totalorder %v41_v4, 3  ;;  %p119_p8 = por %p118_p7, %p117_p6 }
  0x18   :  { %s30_s18 = smul.f32 %s161_s14, %s155_s12  ;;  %v43_v5 = vstv %s29_s16  ;;  %vm54_vm4 = vcmp.eq.s32.totalorder %v41_v4, 4  ;;  %v55_v11 = vstv %s161_s14  ;;  %vm57_vm5 = vcmp.eq.s32.totalorder %v41_v4, 5 }
  0x19   :  { %s31_s19 = smul.f32 %s27_s17, %s159_s13  ;;  %v44_v6 = vsel %vm42_vm0, %v43_v5, 0.0  ;;  %v49_v7 = vstv %s27_s17  ;;  %vm60_vm6 = vcmp.eq.s32.totalorder %v41_v4, 6  ;;  %v61_v15 = vstv %s165_s15  ;;  %p120_p9 = pnand %p119_p8, %p113_p5 }
  0x1a   :  { %s32_s21 = smul.f32 %s157_s0, %s155_s12  ;;  %v46_v8 = vstv %s30_s18  ;;  %vm63_vm7 = vcmp.eq.s32.totalorder %v41_v4, 7  ;;  %vm66_vm8 = vcmp.eq.s32.totalorder %v41_v4, 9  ;;  %vm69_vm9 = vcmp.eq.s32.totalorder %v41_v4, 10 }
  0x1b   :  { %s33_s22 = smul.f32 %s165_s15, %s159_s13  ;;  %v47_v9 = vsel %vm45_vm1, %v46_v8, %v44_v6  ;;  %v52_v10 = vstv %s31_s19  ;;  %v70_v21 = vstv %s34_s20  ;;  %vm72_vm10 = vcmp.eq.s32.totalorder %v41_v4, 11 }
  0x1c   :  { %v50_v12 = vsel %vm48_vm2, %v49_v7, %v47_v9  ;;  %v58_v13 = vstv %s32_s21  ;;  %s35_s23 = smul.f32 %s34_s20, %s159_s13  ;;  %vm75_vm11 = vcmp.eq.s32.totalorder %v41_v4, 15 }
  0x1d   :  { %v53_v14 = vsel %vm51_vm3, %v52_v10, %v50_v12  ;;  %v64_v17 = vstv %s33_s22 }
  0x1e   :  { %v56_v16 = vsel %vm54_vm4, %v55_v11, %v53_v14  ;;  %v73_v23 = vstv %s35_s23 }
  0x1f   :  { %v59_v18 = vsel %vm57_vm5, %v58_v13, %v56_v16 }
  0x20   :  { %v62_v20 = vsel %vm60_vm6, %v61_v15, %v59_v18 }
  0x21   :  { %v65_v22 = vsel %vm63_vm7, %v64_v17, %v62_v20 }
  0x22   :  { %v68_v24 = vsel %vm66_vm8, %v67_v19, %v65_v22 }
  0x23   :  { %v71_v25 = vsel %vm69_vm9, %v70_v21, %v68_v24 }
  0x24   :  { %v74_v26 = vsel %vm72_vm10, %v73_v23, %v71_v25 }
  0x25   :  { %v76_v27 = vsel %vm75_vm11, 1.0, %v74_v26 }
  0x26   :  { %78 = vst.msk [vmem:[#allocation5] sm:$0xf] %vm77_vm12, %v76_v27 }
  0x27   :  { %123 = shalt.err (!%p120_p9)
}
  0x28   :  { %s124_s29 = scalar_lea.hbm %s195_s1, 64 }
  0x29   :  { %p125_p10 = scmp.ne.s32.totalorder %s195_s1, %s124_s29  ;;  %p128_p11 = scmp.lt.u32.totalorder %s124_s29, %s195_s1 }
  0x2b   :  { %p130_p12 = pnand %p128_p11, %p125_p10 }
  0x2d   :  { %133 = shalt.err (!%p130_p12)
}
  0x2e   :  { %88 = dma.vmem_to_hbm [thread:$0]  %s86_s25, 64, %s195_s1, [#allocation3]  }
  0x2f   :  { %136 = dma.done.wait [#allocation3], 64  }
  0x30   :  { %137 = vsyncadd [#allocation3], 4294967232 }
  0x31   :  { %92 = vsyncpa [#allocation3], 1 }
  0x32   :  { %93 = vsyncpa [#allocation4], 1 }

</bundles_post_ra>
